<compile_context>
chip_gen: v5e
topology: v5e:2x2
jax: 0.10.0
libtpu: 0.0.40
codegen_flags: <defaults>
</compile_context>

<pallas_src>
import jax
import jax.numpy as jnp
from jax.experimental import pallas as pl
from jax.experimental.pallas import tpu as pltpu

_HI = jax.lax.Precision.HIGHEST


# --------------------------------------------------------------------------------------
# Kernel body: one (batch_block, head) pair per grid step.
# --------------------------------------------------------------------------------------
def _attn_head_body(q_ref, k_ref, v_ref, wq_ref, wk_ref, wv_ref, wp_ref,
                    bq_ref, bk_ref, bv_ref, bp_ref, o_ref, mask_ref=None):
    h = pl.program_id(1)
    bb, L, D = q_ref.shape          # (batch_block, tgt_len, dim)
    S = k_ref.shape[1]              # src_len
    hd = wq_ref.shape[2]            # head_dim

    # ---- per-head input projections: dense 2-D MXU matmuls -------------------------
    qf = q_ref[...].reshape(bb * L, D)
    kf = k_ref[...].reshape(bb * S, D)
    vf = v_ref[...].reshape(bb * S, D)

    qh = (jnp.dot(qf, wq_ref[0], preferred_element_type=jnp.float32,
                  precision=_HI) + bq_ref[0]).reshape(bb, L, hd)
    kh = (jnp.dot(kf, wk_ref[0], preferred_element_type=jnp.float32,
                  precision=_HI) + bk_ref[0]).reshape(bb, S, hd)
    vh = (jnp.dot(vf, wv_ref[0], preferred_element_type=jnp.float32,
                  precision=_HI) + bv_ref[0]).reshape(bb, S, hd)

    # ---- scaled-dot-product attention (batched over the batch block) ---------------
    s = jnp.einsum('bld,bsd->bls', qh, kh,
                   preferred_element_type=jnp.float32, precision=_HI)
    if mask_ref is not None:
        # key_padding_mask: (bb, 1, S) int32, nonzero == masked out.
        s = jnp.where(mask_ref[...] != 0, -1e30, s)
    m = jnp.max(s, axis=-1, keepdims=True)
    p = jnp.exp(s - m)
    p = p / jnp.sum(p, axis=-1, keepdims=True)          # exact softmax
    attn = jnp.einsum('bls,bsd->bld', p.astype(vh.dtype), vh,
                      preferred_element_type=jnp.float32, precision=_HI)

    # ---- this head's slice of the output projection, accumulated into o_ref --------
    contrib = jnp.dot(attn.reshape(bb * L, hd).astype(wp_ref.dtype), wp_ref[0],
                      preferred_element_type=jnp.float32,
                      precision=_HI).reshape(bb, L, D)

    @pl.when(h == 0)
    def _():
        o_ref[...] = contrib + bp_ref[...]

    @pl.when(h != 0)
    def _():
        o_ref[...] = o_ref[...] + contrib


def _attn_head_kernel_unmasked(q_ref, k_ref, v_ref, wq_ref, wk_ref, wv_ref,
                               wp_ref, bq_ref, bk_ref, bv_ref, bp_ref, o_ref):
    _attn_head_body(q_ref, k_ref, v_ref, wq_ref, wk_ref, wv_ref, wp_ref,
                    bq_ref, bk_ref, bv_ref, bp_ref, o_ref, mask_ref=None)


def _attn_head_kernel_masked(q_ref, k_ref, v_ref, mask_ref, wq_ref, wk_ref,
                             wv_ref, wp_ref, bq_ref, bk_ref, bv_ref, bp_ref,
                             o_ref):
    _attn_head_body(q_ref, k_ref, v_ref, wq_ref, wk_ref, wv_ref, wp_ref,
                    bq_ref, bk_ref, bv_ref, bp_ref, o_ref, mask_ref=mask_ref)


# --------------------------------------------------------------------------------------
# Batch-first wrapper (use this directly to avoid layout transposes entirely)
# --------------------------------------------------------------------------------------
def attention_forward_batch_first(qb, kb, vb, params, num_heads,
                                  key_padding_mask=None, batch_block=1,
                                  compute_dtype=None):
    bsz, tgt_len, dim = qb.shape
    src_len = kb.shape[1]
    assert dim % num_heads == 0
    assert bsz % batch_block == 0
    hd = dim // num_heads
    scale = float(hd) ** (-0.5)
    bb = batch_block

    # Pre-split weights head-major: (H, Din, hd) for q/k/v, (H, hd, Dout) for proj.
    # q scale folded into wq (bias unscaled -- identical to `q = q*scale; q = self.q(q)`).
    wq3 = (params["wq"].T * scale).reshape(dim, num_heads, hd).transpose(1, 0, 2)
    wk3 = params["wk"].T.reshape(dim, num_heads, hd).transpose(1, 0, 2)
    wv3 = params["wv"].T.reshape(dim, num_heads, hd).transpose(1, 0, 2)
    wp3 = params["wp"].T.reshape(num_heads, hd, dim)
    bq3 = params["bq"].astype(jnp.float32).reshape(num_heads, 1, hd)
    bk3 = params["bk"].astype(jnp.float32).reshape(num_heads, 1, hd)
    bv3 = params["bv"].astype(jnp.float32).reshape(num_heads, 1, hd)
    bp = params["bp"].astype(jnp.float32).reshape(1, dim)

    if compute_dtype is not None:
        # Production option (bf16 matmul operands); keep f32 accumulation/softmax.
        qb, kb, vb = (a.astype(compute_dtype) for a in (qb, kb, vb))
        wq3, wk3, wv3, wp3 = (w.astype(compute_dtype) for w in (wq3, wk3, wv3, wp3))

    grid = (bsz // bb, num_heads)

    act_spec_q = pl.BlockSpec((bb, tgt_len, dim), lambda b, h: (b, 0, 0))
    act_spec_kv = pl.BlockSpec((bb, src_len, dim), lambda b, h: (b, 0, 0))
    w_in_spec = pl.BlockSpec((1, dim, hd), lambda b, h: (h, 0, 0))
    w_out_spec = pl.BlockSpec((1, hd, dim), lambda b, h: (h, 0, 0))
    b_in_spec = pl.BlockSpec((1, 1, hd), lambda b, h: (h, 0, 0))
    b_out_spec = pl.BlockSpec((1, dim), lambda b, h: (0, 0))
    out_spec = pl.BlockSpec((bb, tgt_len, dim), lambda b, h: (b, 0, 0))

    in_arrays = [qb, kb, vb]
    in_specs = [act_spec_q, act_spec_kv, act_spec_kv]
    if key_padding_mask is not None:
        mask3 = key_padding_mask.astype(jnp.int32).reshape(bsz, 1, src_len)
        in_arrays.append(mask3)
        in_specs.append(pl.BlockSpec((bb, 1, src_len), lambda b, h: (b, 0, 0)))
        kernel = _attn_head_kernel_masked
    else:
        kernel = _attn_head_kernel_unmasked
    in_arrays += [wq3, wk3, wv3, wp3, bq3, bk3, bv3, bp]
    in_specs += [w_in_spec, w_in_spec, w_in_spec, w_out_spec,
                 b_in_spec, b_in_spec, b_in_spec, b_out_spec]

    return pl.pallas_call(
        kernel,
        out_shape=jax.ShapeDtypeStruct((bsz, tgt_len, dim), jnp.float32),
        grid=grid,
        in_specs=in_specs,
        out_specs=out_spec,
        compiler_params=pltpu.CompilerParams(
            dimension_semantics=("parallel", "arbitrary"),
            vmem_limit_bytes=32 * 1024 * 1024,
        ),
    )(*in_arrays)


# --------------------------------------------------------------------------------------
# Module-compatible wrapper: (seq, batch, dim) in / out, like the PyTorch module.
# --------------------------------------------------------------------------------------
def attention_forward(q, k, v, params, num_heads, key_padding_mask=None,
                      batch_block=1, compute_dtype=None):
    out_b = attention_forward_batch_first(
        jnp.transpose(q, (1, 0, 2)),
        jnp.transpose(k, (1, 0, 2)),
        jnp.transpose(v, (1, 0, 2)),
        params, num_heads,
        key_padding_mask=key_padding_mask,
        batch_block=batch_block,
        compute_dtype=compute_dtype,
    )
    return jnp.transpose(out_b, (1, 0, 2))


# --------------------------------------------------------------------------------------
# Pure-JAX reference (numerical sanity check)
# --------------------------------------------------------------------------------------
def attention_reference(q, k, v, params, num_heads, key_padding_mask=None):
    tgt_len, bsz, dim = q.shape
    src_len = k.shape[0]
    hd = dim // num_heads
    scale = float(hd) ** (-0.5)
    hp = jax.lax.Precision.HIGHEST

    qp = jnp.matmul(q * scale, params["wq"].T, precision=hp) + params["bq"]
    kp = jnp.matmul(k, params["wk"].T, precision=hp) + params["bk"]
    vp = jnp.matmul(v, params["wv"].T, precision=hp) + params["bv"]

    qh = qp.reshape(tgt_len, bsz * num_heads, hd).transpose(1, 0, 2)
    kh = kp.reshape(src_len, bsz * num_heads, hd).transpose(1, 0, 2)
    vh = vp.reshape(src_len, bsz * num_heads, hd).transpose(1, 0, 2)

    s = jnp.einsum("bld,bsd->bls", qh, kh, precision=hp)
    if key_padding_mask is not None:
        mrep = jnp.repeat(key_padding_mask.astype(bool), num_heads, axis=0)
        s = jnp.where(mrep[:, None, :], -jnp.inf, s)
    p = jax.nn.softmax(s, axis=-1)
    o = jnp.einsum("bls,bsd->bld", p, vh, precision=hp)
    o = o.transpose(1, 0, 2).reshape(tgt_len, bsz, dim)
    return jnp.matmul(o, params["wp"].T, precision=hp) + params["bp"]


# --------------------------------------------------------------------------------------
# Deterministic parameter init (xavier-uniform weights, small random biases)
# --------------------------------------------------------------------------------------
def init_params(key, dim):
    def xavier(kk, shape):
        fan_in, fan_out = shape[1], shape[0]
        limit = (6.0 / (fan_in + fan_out)) ** 0.5
        return jax.random.uniform(kk, shape, jnp.float32, -limit, limit)

    k1, k2, k3, k4, k5, k6, k7, k8 = jax.random.split(key, 8)
    return {
        "wq": xavier(k1, (dim, dim)),
        "bq": 0.1 * jax.random.normal(k5, (dim,), jnp.float32),
        "wk": xavier(k2, (dim, dim)),
        "bk": 0.1 * jax.random.normal(k6, (dim,), jnp.float32),
        "wv": xavier(k3, (dim, dim)),
        "bv": 0.1 * jax.random.normal(k7, (dim,), jnp.float32),
        "wp": xavier(k4, (dim, dim)),
        "bp": 0.1 * jax.random.normal(k8, (dim,), jnp.float32),
    }


if __name__ == "__main__":
    # Small shapes consistent with the module: dim divisible by num_heads=8.
    tgt_len, src_len, bsz, dim, num_heads = 16, 8, 2, 32, 8

    key = jax.random.PRNGKey(0)
    kq, kk, kv, kp = jax.random.split(key, 4)
    q = jax.random.normal(kq, (tgt_len, bsz, dim), jnp.float32)
    k = jax.random.normal(kk, (src_len, bsz, dim), jnp.float32)
    v = jax.random.normal(kv, (src_len, bsz, dim), jnp.float32)
    params = init_params(kp, dim)

    # Unmasked path.
    out = attention_forward(q, k, v, params, num_heads)
    out = jax.block_until_ready(out)
    ref = attention_reference(q, k, v, params, num_heads)
    assert out.shape == (tgt_len, bsz, dim)
    err = float(jnp.max(jnp.abs(out - ref)))
    assert jnp.allclose(out, ref, rtol=2e-3, atol=2e-3), f"max abs err = {err}"

    # key_padding_mask path (each row keeps at least one unmasked key).
    mask = jnp.array([[0, 1, 0, 0, 1, 0, 0, 0],
                      [1, 0, 0, 0, 0, 0, 1, 0]], dtype=bool)
    out_m = attention_forward(q, k, v, params, num_heads, key_padding_mask=mask)
    out_m = jax.block_until_ready(out_m)
    ref_m = attention_reference(q, k, v, params, num_heads, key_padding_mask=mask)
    err_m = float(jnp.max(jnp.abs(out_m - ref_m)))
    assert jnp.allclose(out_m, ref_m, rtol=2e-3, atol=2e-3), f"masked max abs err = {err_m}"

    print("KERNEL_OK")
</pallas_src>

<mosaic_0001>
module attributes {stable_mosaic.version = 11 : i64} {
  func.func @_attn_head_kernel_unmasked(%arg0: i32, %arg1: i32, %arg2: memref<1x16x32xf32, #tpu.memory_space<vmem>>, %arg3: memref<1x8x32xf32, #tpu.memory_space<vmem>>, %arg4: memref<1x8x32xf32, #tpu.memory_space<vmem>>, %arg5: memref<1x32x4xf32, #tpu.memory_space<vmem>>, %arg6: memref<1x32x4xf32, #tpu.memory_space<vmem>>, %arg7: memref<1x32x4xf32, #tpu.memory_space<vmem>>, %arg8: memref<1x4x32xf32, #tpu.memory_space<vmem>>, %arg9: memref<1x1x4xf32, #tpu.memory_space<vmem>>, %arg10: memref<1x1x4xf32, #tpu.memory_space<vmem>>, %arg11: memref<1x1x4xf32, #tpu.memory_space<vmem>>, %arg12: memref<1x32xf32, #tpu.memory_space<vmem>>, %arg13: memref<1x16x32xf32, #tpu.memory_space<vmem>>) attributes {dimension_semantics = [#tpu.dimension_semantics<parallel>, #tpu.dimension_semantics<arbitrary>], iteration_bounds = array<i64: 2, 8>, scalar_prefetch = 0 : i64, scratch_operands = 0 : i64, tpu.core_type = #tpu.core_type<tc>, window_params = [{transform_indices = @transform_0, window_bounds = array<i64: 1, 16, 32>}, {transform_indices = @transform_1, window_bounds = array<i64: 1, 8, 32>}, {transform_indices = @transform_2, window_bounds = array<i64: 1, 8, 32>}, {transform_indices = @transform_3, window_bounds = array<i64: 1, 32, 4>}, {transform_indices = @transform_4, window_bounds = array<i64: 1, 32, 4>}, {transform_indices = @transform_5, window_bounds = array<i64: 1, 32, 4>}, {transform_indices = @transform_6, window_bounds = array<i64: 1, 4, 32>}, {transform_indices = @transform_7, window_bounds = array<i64: 1, 1, 4>}, {transform_indices = @transform_8, window_bounds = array<i64: 1, 1, 4>}, {transform_indices = @transform_9, window_bounds = array<i64: 1, 1, 4>}, {pipeline_mode = #tpu.pipeline_mode<synchronous>, transform_indices = @transform_10, window_bounds = array<i64: 1, 32>}, {transform_indices = @transform_11, window_bounds = array<i64: 1, 16, 32>}]} {
    %c0 = arith.constant 0 : index
    %c0_0 = arith.constant 0 : index
    %c0_1 = arith.constant 0 : index
    %0 = vector.load %arg2[%c0, %c0_0, %c0_1] : memref<1x16x32xf32, #tpu.memory_space<vmem>>, vector<1x16x32xf32>
    %1 = vector.shape_cast %0 : vector<1x16x32xf32> to vector<16x32xf32>
    %c0_2 = arith.constant 0 : index
    %c0_3 = arith.constant 0 : index
    %c0_4 = arith.constant 0 : index
    %2 = vector.load %arg3[%c0_2, %c0_3, %c0_4] : memref<1x8x32xf32, #tpu.memory_space<vmem>>, vector<1x8x32xf32>
    %3 = vector.shape_cast %2 : vector<1x8x32xf32> to vector<8x32xf32>
    %c0_5 = arith.constant 0 : index
    %c0_6 = arith.constant 0 : index
    %c0_7 = arith.constant 0 : index
    %4 = vector.load %arg4[%c0_5, %c0_6, %c0_7] : memref<1x8x32xf32, #tpu.memory_space<vmem>>, vector<1x8x32xf32>
    %5 = vector.shape_cast %4 : vector<1x8x32xf32> to vector<8x32xf32>
    %c0_8 = arith.constant 0 : index
    %c0_9 = arith.constant 0 : index
    %c0_10 = arith.constant 0 : index
    %6 = vector.load %arg5[%c0_8, %c0_9, %c0_10] : memref<1x32x4xf32, #tpu.memory_space<vmem>>, vector<1x32x4xf32>
    %7 = vector.shape_cast %6 : vector<1x32x4xf32> to vector<32x4xf32>
    %cst = arith.constant dense<0.000000e+00> : vector<16x4xf32>
    %8 = tpu.matmul %1, %7, %cst {dimension_numbers = #tpu.dot_dimension_numbers<[1], [0], [0], [1], [0, 0, 1, 1], [], []>, precision = #tpu.contract_precision<fp32>} : vector<16x32xf32>, vector<32x4xf32>, vector<16x4xf32> -> vector<16x4xf32>
    %c0_11 = arith.constant 0 : index
    %c0_12 = arith.constant 0 : index
    %c0_13 = arith.constant 0 : index
    %9 = vector.load %arg9[%c0_11, %c0_12, %c0_13] : memref<1x1x4xf32, #tpu.memory_space<vmem>>, vector<1x1x4xf32>
    %10 = vector.shape_cast %9 : vector<1x1x4xf32> to vector<1x4xf32>
    %11 = vector.broadcast %10 : vector<1x4xf32> to vector<16x4xf32>
    %12 = arith.addf %8, %11 : vector<16x4xf32>
    %13 = vector.shape_cast %12 : vector<16x4xf32> to vector<1x16x4xf32>
    %c0_14 = arith.constant 0 : index
    %c0_15 = arith.constant 0 : index
    %c0_16 = arith.constant 0 : index
    %14 = vector.load %arg6[%c0_14, %c0_15, %c0_16] : memref<1x32x4xf32, #tpu.memory_space<vmem>>, vector<1x32x4xf32>
    %15 = vector.shape_cast %14 : vector<1x32x4xf32> to vector<32x4xf32>
    %cst_17 = arith.constant dense<0.000000e+00> : vector<8x4xf32>
    %16 = tpu.matmul %3, %15, %cst_17 {dimension_numbers = #tpu.dot_dimension_numbers<[1], [0], [0], [1], [0, 0, 1, 1], [], []>, precision = #tpu.contract_precision<fp32>} : vector<8x32xf32>, vector<32x4xf32>, vector<8x4xf32> -> vector<8x4xf32>
    %c0_18 = arith.constant 0 : index
    %c0_19 = arith.constant 0 : index
    %c0_20 = arith.constant 0 : index
    %17 = vector.load %arg10[%c0_18, %c0_19, %c0_20] : memref<1x1x4xf32, #tpu.memory_space<vmem>>, vector<1x1x4xf32>
    %18 = vector.shape_cast %17 : vector<1x1x4xf32> to vector<1x4xf32>
    %19 = vector.broadcast %18 : vector<1x4xf32> to vector<8x4xf32>
    %20 = arith.addf %16, %19 : vector<8x4xf32>
    %21 = vector.shape_cast %20 : vector<8x4xf32> to vector<1x8x4xf32>
    %c0_21 = arith.constant 0 : index
    %c0_22 = arith.constant 0 : index
    %c0_23 = arith.constant 0 : index
    %22 = vector.load %arg7[%c0_21, %c0_22, %c0_23] : memref<1x32x4xf32, #tpu.memory_space<vmem>>, vector<1x32x4xf32>
    %23 = vector.shape_cast %22 : vector<1x32x4xf32> to vector<32x4xf32>
    %cst_24 = arith.constant dense<0.000000e+00> : vector<8x4xf32>
    %24 = tpu.matmul %5, %23, %cst_24 {dimension_numbers = #tpu.dot_dimension_numbers<[1], [0], [0], [1], [0, 0, 1, 1], [], []>, precision = #tpu.contract_precision<fp32>} : vector<8x32xf32>, vector<32x4xf32>, vector<8x4xf32> -> vector<8x4xf32>
    %c0_25 = arith.constant 0 : index
    %c0_26 = arith.constant 0 : index
    %c0_27 = arith.constant 0 : index
    %25 = vector.load %arg11[%c0_25, %c0_26, %c0_27] : memref<1x1x4xf32, #tpu.memory_space<vmem>>, vector<1x1x4xf32>
    %26 = vector.shape_cast %25 : vector<1x1x4xf32> to vector<1x4xf32>
    %27 = vector.broadcast %26 : vector<1x4xf32> to vector<8x4xf32>
    %28 = arith.addf %24, %27 : vector<8x4xf32>
    %29 = vector.shape_cast %28 : vector<8x4xf32> to vector<1x8x4xf32>
    "tpu.trace_start"() <{level = 10 : i32, message = "bld,bsd->bls"}> : () -> ()
    %cst_28 = arith.constant dense<0.000000e+00> : vector<1x16x8xf32>
    %30 = tpu.matmul %13, %21, %cst_28 {dimension_numbers = #tpu.dot_dimension_numbers<[2], [2], [1], [1], [0, 0, 0, 1, 1, 1], [0], [0]>, precision = #tpu.contract_precision<fp32>} : vector<1x16x4xf32>, vector<1x8x4xf32>, vector<1x16x8xf32> -> vector<1x16x8xf32>
    "tpu.trace_stop"() : () -> ()
    %cst_29 = arith.constant dense<0xFF800000> : vector<1x16xf32>
    %31 = vector.multi_reduction <maximumf>, %30, %cst_29 [2] : vector<1x16x8xf32> to vector<1x16xf32>
    %32 = vector.shape_cast %31 : vector<1x16xf32> to vector<1x16x1xf32>
    %33 = vector.broadcast %32 : vector<1x16x1xf32> to vector<1x16x8xf32>
    %34 = arith.subf %30, %33 : vector<1x16x8xf32>
    %35 = math.exp %34 : vector<1x16x8xf32>
    %cst_30 = arith.constant dense<0.000000e+00> : vector<1x16xf32>
    %36 = vector.multi_reduction <add>, %35, %cst_30 [2] : vector<1x16x8xf32> to vector<1x16xf32>
    %37 = vector.shape_cast %36 : vector<1x16xf32> to vector<1x16x1xf32>
    %38 = vector.broadcast %37 : vector<1x16x1xf32> to vector<1x16x8xf32>
    %39 = arith.divf %35, %38 : vector<1x16x8xf32>
    "tpu.trace_start"() <{level = 10 : i32, message = "bls,bsd->bld"}> : () -> ()
    %cst_31 = arith.constant dense<0.000000e+00> : vector<1x16x4xf32>
    %40 = tpu.matmul %39, %29, %cst_31 {dimension_numbers = #tpu.dot_dimension_numbers<[2], [1], [1], [2], [0, 0, 0, 1, 1, 2], [0], [0]>, precision = #tpu.contract_precision<fp32>} : vector<1x16x8xf32>, vector<1x8x4xf32>, vector<1x16x4xf32> -> vector<1x16x4xf32>
    "tpu.trace_stop"() : () -> ()
    %41 = vector.shape_cast %40 : vector<1x16x4xf32> to vector<16x4xf32>
    %c0_32 = arith.constant 0 : index
    %c0_33 = arith.constant 0 : index
    %c0_34 = arith.constant 0 : index
    %42 = vector.load %arg8[%c0_32, %c0_33, %c0_34] : memref<1x4x32xf32, #tpu.memory_space<vmem>>, vector<1x4x32xf32>
    %43 = vector.shape_cast %42 : vector<1x4x32xf32> to vector<4x32xf32>
    %cst_35 = arith.constant dense<0.000000e+00> : vector<16x32xf32>
    %44 = tpu.matmul %41, %43, %cst_35 {dimension_numbers = #tpu.dot_dimension_numbers<[1], [0], [0], [1], [0, 0, 1, 1], [], []>, precision = #tpu.contract_precision<fp32>} : vector<16x4xf32>, vector<4x32xf32>, vector<16x32xf32> -> vector<16x32xf32>
    %45 = vector.shape_cast %44 : vector<16x32xf32> to vector<1x16x32xf32>
    %c0_i32 = arith.constant 0 : i32
    %46 = arith.cmpi eq, %arg1, %c0_i32 : i32
    %47 = arith.extui %46 : i1 to i32
    %c0_i32_36 = arith.constant 0 : i32
    %48 = arith.cmpi ne, %47, %c0_i32_36 : i32
    scf.if %48 {
      %c0_39 = arith.constant 0 : index
      %c0_40 = arith.constant 0 : index
      %52 = vector.load %arg12[%c0_39, %c0_40] : memref<1x32xf32, #tpu.memory_space<vmem>>, vector<1x32xf32>
      %53 = vector.shape_cast %52 : vector<1x32xf32> to vector<1x1x32xf32>
      %54 = vector.broadcast %53 : vector<1x1x32xf32> to vector<1x16x32xf32>
      %55 = arith.addf %45, %54 : vector<1x16x32xf32>
      %c0_41 = arith.constant 0 : index
      %c0_42 = arith.constant 0 : index
      %c0_43 = arith.constant 0 : index
      %56 = vector.load %arg13[%c0_41, %c0_42, %c0_43] : memref<1x16x32xf32, #tpu.memory_space<vmem>>, vector<1x16x32xf32>
      tpu.vector_store %arg13[%c0_41, %c0_42, %c0_43], %55 {strides = array<i32>} : memref<1x16x32xf32, #tpu.memory_space<vmem>>, vector<1x16x32xf32>,
    } else {
    }
    %c0_i32_37 = arith.constant 0 : i32
    %49 = arith.cmpi ne, %arg1, %c0_i32_37 : i32
    %50 = arith.extui %49 : i1 to i32
    %c0_i32_38 = arith.constant 0 : i32
    %51 = arith.cmpi ne, %50, %c0_i32_38 : i32
    scf.if %51 {
      %c0_39 = arith.constant 0 : index
      %c0_40 = arith.constant 0 : index
      %c0_41 = arith.constant 0 : index
      %52 = vector.load %arg13[%c0_39, %c0_40, %c0_41] : memref<1x16x32xf32, #tpu.memory_space<vmem>>, vector<1x16x32xf32>
      %53 = arith.addf %52, %45 : vector<1x16x32xf32>
      %c0_42 = arith.constant 0 : index
      %c0_43 = arith.constant 0 : index
      %c0_44 = arith.constant 0 : index
      %54 = vector.load %arg13[%c0_42, %c0_43, %c0_44] : memref<1x16x32xf32, #tpu.memory_space<vmem>>, vector<1x16x32xf32>
      tpu.vector_store %arg13[%c0_42, %c0_43, %c0_44], %53 {strides = array<i32>} : memref<1x16x32xf32, #tpu.memory_space<vmem>>, vector<1x16x32xf32>,
    } else {
    }
    return
  }
  func.func @transform_0(%arg0: i32, %arg1: i32) -> (i32, i32, i32) {
    %c0_i32 = arith.constant 0 : i32
    %c0_i32_0 = arith.constant 0 : i32
    %c0_i32_1 = arith.constant 0 : i32
    return %arg0, %c0_i32, %c0_i32_0 : i32, i32, i32
  }
  func.func @transform_1(%arg0: i32, %arg1: i32) -> (i32, i32, i32) {
    %c0_i32 = arith.constant 0 : i32
    %c0_i32_0 = arith.constant 0 : i32
    %c0_i32_1 = arith.constant 0 : i32
    return %arg0, %c0_i32, %c0_i32_0 : i32, i32, i32
  }
  func.func @transform_2(%arg0: i32, %arg1: i32) -> (i32, i32, i32) {
    %c0_i32 = arith.constant 0 : i32
    %c0_i32_0 = arith.constant 0 : i32
    %c0_i32_1 = arith.constant 0 : i32
    return %arg0, %c0_i32, %c0_i32_0 : i32, i32, i32
  }
  func.func @transform_3(%arg0: i32, %arg1: i32) -> (i32, i32, i32) {
    %c0_i32 = arith.constant 0 : i32
    %c0_i32_0 = arith.constant 0 : i32
    %c0_i32_1 = arith.constant 0 : i32
    return %arg1, %c0_i32, %c0_i32_0 : i32, i32, i32
  }
  func.func @transform_4(%arg0: i32, %arg1: i32) -> (i32, i32, i32) {
    %c0_i32 = arith.constant 0 : i32
    %c0_i32_0 = arith.constant 0 : i32
    %c0_i32_1 = arith.constant 0 : i32
    return %arg1, %c0_i32, %c0_i32_0 : i32, i32, i32
  }
  func.func @transform_5(%arg0: i32, %arg1: i32) -> (i32, i32, i32) {
    %c0_i32 = arith.constant 0 : i32
    %c0_i32_0 = arith.constant 0 : i32
    %c0_i32_1 = arith.constant 0 : i32
    return %arg1, %c0_i32, %c0_i32_0 : i32, i32, i32
  }
  func.func @transform_6(%arg0: i32, %arg1: i32) -> (i32, i32, i32) {
    %c0_i32 = arith.constant 0 : i32
    %c0_i32_0 = arith.constant 0 : i32
    %c0_i32_1 = arith.constant 0 : i32
    return %arg1, %c0_i32, %c0_i32_0 : i32, i32, i32
  }
  func.func @transform_7(%arg0: i32, %arg1: i32) -> (i32, i32, i32) {
    %c0_i32 = arith.constant 0 : i32
    %c0_i32_0 = arith.constant 0 : i32
    %c0_i32_1 = arith.constant 0 : i32
    return %arg1, %c0_i32, %c0_i32_0 : i32, i32, i32
  }
  func.func @transform_8(%arg0: i32, %arg1: i32) -> (i32, i32, i32) {
    %c0_i32 = arith.constant 0 : i32
    %c0_i32_0 = arith.constant 0 : i32
    %c0_i32_1 = arith.constant 0 : i32
    return %arg1, %c0_i32, %c0_i32_0 : i32, i32, i32
  }
  func.func @transform_9(%arg0: i32, %arg1: i32) -> (i32, i32, i32) {
    %c0_i32 = arith.constant 0 : i32
    %c0_i32_0 = arith.constant 0 : i32
    %c0_i32_1 = arith.constant 0 : i32
    return %arg1, %c0_i32, %c0_i32_0 : i32, i32, i32
  }
  func.func @transform_10(%arg0: i32, %arg1: i32) -> (i32, i32) {
    %c0_i32 = arith.constant 0 : i32
    %c0_i32_0 = arith.constant 0 : i32
    %c0_i32_1 = arith.constant 0 : i32
    return %c0_i32, %c0_i32_0 : i32, i32
  }
  func.func @transform_11(%arg0: i32, %arg1: i32) -> (i32, i32, i32) {
    %c0_i32 = arith.constant 0 : i32
    %c0_i32_0 = arith.constant 0 : i32
    %c0_i32_1 = arith.constant 0 : i32
    return %arg0, %c0_i32, %c0_i32_0 : i32, i32, i32
  }
}

</mosaic_0001>

<bundles_post_ra>
// kernel: tpu_custom_call.1
= control target key start
LH: loop header
LB: loop body
LE: loop exit
PB: predicated region body
PF: predicated region fallthrough
CT: control target
= control target key end

     0   :  { %s2590_s0 = inlined_call_operand.vmem [shape: f32[2,16,32], index: 0, kind: input, shape index: {}]   ;;  %s2591_s1 = inlined_call_operand.vmem [shape: f32[2,8,32], index: 1, kind: input, shape index: {}]   ;;  %s2592_s2 = inlined_call_operand.vmem [shape: f32[2,8,32], index: 2, kind: input, shape index: {}]   ;;  %s2593_s3 = inlined_call_operand.vmem [shape: f32[8,32,4], index: 3, kind: input, shape index: {}]   ;;  %s2594_s4 = inlined_call_operand.vmem [shape: f32[8,32,4], index: 4, kind: input, shape index: {}]   ;;  %s2595_s5 = inlined_call_operand.vmem [shape: f32[8,32,4], index: 5, kind: input, shape index: {}]   ;;  %s2596_s6 = inlined_call_operand.vmem [shape: f32[8,4,32], index: 6, kind: input, shape index: {}]   ;;  %s2597_s7 = inlined_call_operand.vmem [shape: f32[8,1,4], index: 7, kind: input, shape index: {}]   ;;  %s2598_s8 = inlined_call_operand.vmem [shape: f32[8,1,4], index: 8, kind: input, shape index: {}]   ;;  %s2599_s9 = inlined_call_operand.vmem [shape: f32[8,1,4], index: 9, kind: input, shape index: {}]   ;;  %s2600_s10 = inlined_call_operand.vmem [shape: f32[1,32], index: 10, kind: input, shape index: {}]   ;;  %s2601_s11 = inlined_call_operand.hbm [shape: f32[2,16,32], index: 11, kind: output, shape index: {}]  }
   0x1   :  { %2608 = sst [smem:[#allocation11_spill]] %s2590_s0 }
   0x2   :  { %2609 = sst [smem:[#allocation12_spill]] %s2591_s1 }
   0x3   :  { %2610 = sst [smem:[#allocation13_spill]] %s2593_s3 }
   0x4   :  { %16 = vsyncpa [#allocation3], 0 }
   0x5   :  { %18 = vsyncpa [#allocation3 + $0x1], 0  ;;  %s2274_s17 = smov 0   ;;  %s2276_s18 = smov 0  }
   0x6   :  { %s2278_s19 = smov 0   ;;  %s2280_s20 = smov 0  }
   0x7   :  { %s2282_s21 = smov 0   ;;  %s2284_s22 = smov 0  }
   0x8   :  { %s2286_s23 = smov 0   ;;  %s2288_s24 = smov 0  }
   0x9 LB: > { %2611 = sst [smem:[#allocation5_spill]] %s2190_s19  ;;  %s1994_s25 = sadd.s32 4294967295, %s2210_s24   ;;  %s2210_s24 = sphi %s2288_s24, %s24_s24   ;;  %s2206_s23 = sphi %s2286_s23, %s2630_s23   ;;  %s2202_s22 = sphi %s2284_s22, %s2629_s22   ;;  %s2198_s21 = sphi %s2282_s21, %s2628_s21   ;;  %s2194_s20 = sphi %s2280_s20, %s2627_s20   ;;  %s2190_s19 = sphi %s2278_s19, %s2626_s19   ;;  %s2186_s18 = sphi %s2276_s18, %s2632_s18   ;;  %s2182_s17 = sphi %s2274_s17, %s2631_s17  }
   0xa   : > { %2612 = sst [smem:[#allocation6_spill]] %s2202_s22  ;;  %s1995_s26 = sadd.s32 4294967294, %s2210_s24  }
   0xb   : > { %2613 = sst [smem:[#allocation7_spill]] %s2206_s23  ;;  %s33_s27 = sadd.s32 1, %s2202_s22 }
   0xc   : > { %p34_p0 = scmp.ge.s32.totalorder %s33_s27, 8  ;;  %s36_s28 = sadd.s32 1, %s2206_s23 }
   0xd   : > { %p334_p1 = scmp.ne.s32.totalorder %s2190_s19, %s2186_s18  ;;  %p335_p2 = scmp.eq.s32.totalorder %s1994_s25, 15 }
   0xe   : > { %s2634_s27 = smov (%p34_p0, %s33_s27), 0  ;;  %s2636_s28 = smov (!%p34_p0, %s36_s28), %s2206_s23 }
   0xf   : > { %2614 = sst [smem:[#allocation8_spill]] %s2634_s27  ;;  %p2323_p3 = por %p335_p2, %p334_p1 }
  0x10   : > { %p340_p4 = scmp.ne.s32.totalorder %s2186_s18, %s2182_s17  ;;  %p38_p5 = scmp.ge.s32.totalorder %s2636_s28, 2 }
  0x11   : > { %p341_p6 = scmp.eq.s32.totalorder %s1995_s26, 15  ;;  %p1998_p7 = scmp.ge.s32.totalorder %s2210_s24, 1 }
  0x12   : > { %p433_p8 = scmp.lt.s32.totalorder %s2210_s24, 17  ;;  %s2638_s28 = smov (%p38_p5, %s2636_s28), 0 }
  0x13   : > { %2616 = sst [smem:[#allocation9_spill]] %s2638_s28  ;;  %p2333_p9 = por %p341_p6, %p340_p4 }
  0x14   : > { %p434_p10 = pnand %p1998_p7, %p433_p8  ;;  %s321_s12 = ssub.s32 %s2206_s23, %s2638_s28 }
  0x15   : > { %s324_s13 = sadd.s32 1, %s2190_s19  ;;  %p322_p11 = scmp.eq.s32.totalorder %s321_s12, 0 }
  0x16   : > { %437 = sbr.rel (%p434_p10) target bundleno = 1005 (0x3ed), region = 64  ;;  %p522_p12 = scmp.lt.s32.totalorder (!%p434_p10), %s2194_s20, 7 }
  0x17   : > { %s2341_s14 = scalar_select %p322_p11, %s2190_s19, %s324_s13  }
  0x18   : > { %p509_p13 = scmp.lt.s32.totalorder (!%p434_p10), %s2198_s21, 1  ;;  %s2606_s15 = sand.u32 (!%p434_p10), 1, %s2186_s18  }
  0x19   : > { %2618 = sst [smem:[#allocation10_spill]] %s2341_s14  ;;  %s2357_s12 = sshll.u32 (!%p434_p10), %s2606_s15, 4 }
  0x1a   : > { %s2619_s3 = sld [smem:[#allocation13_spill]] (!%p434_p10)  ;;  %p2011_p0 = scmp.ne.s32.totalorder (!%p434_p10), %s2194_s20, 0 }
  0x1b   : > { %s2347_s16 = scalar_select %p522_p12, %s2194_s20, 7  ;;  %vm562_vm0 = vcmask 261120   ;;  %vm1177_vm1 = vcmask 31744   ;;  %vm1364_vm2 = vcmask 64512   ;;  %vm1603_vm11 = vcmask 1043456  }
  0x1c   : > { %s2350_s25 = scalar_select %p509_p13, %s2198_s21, 1 }
  0x1d   : > { %s2353_s26 = sshll.u32 %s2347_s16, 5  ;;  %s2620_s0 = sld [smem:[#allocation11_spill]] }
  0x1e   : > { %s2018_s23 = sshll.u32 %s2350_s25, 4  ;;  %s2377_s15 = scalar_lea.vmem %s2594_s4, %s2353_s26 }
  0x1f   : > { %v788_v15 = vld [vmem:[%s2377_s15 + $0x18] sm:$0xff]  ;;  %v787_v22 = vld [vmem:[%s2377_s15 + $0x10] sm:$0xff]  ;;  %v786_v32 = vld [vmem:[%s2377_s15 + $0x8] sm:$0xff]  ;;  %s2621_s1 = sld [smem:[#allocation12_spill]] }
  0x20   : > { %s526_s27 = scalar_lea.vmem %s2619_s3, %s2353_s26  ;;  %v2408_v25 = vand.u32 4294901760, %v788_v15  ;;  %v2416_v31 = vand.u32 4294901760, %v787_v22  ;;  %v785_v38 = vld [vmem:[%s2377_s15] sm:$0xff]  ;;  %v2437_v42 = vand.u32 4294901760, %v786_v32  ;;  %s2623_s3 = scalar_lea.vmem %s2597_s7, %s2347_s16 }
  0x21   : > { %v557_v0 = vld [vmem:[%s526_s27 + $0x18] sm:$0xff]  ;;  %v556_v1 = vld [vmem:[%s526_s27 + $0x10] sm:$0xff]  ;;  %v555_v2 = vld [vmem:[%s526_s27 + $0x8] sm:$0xff]  ;;  %v2440_v46 = vand.u32 4294901760, %v785_v38 }
  0x22   : > { %v2367_v3 = vand.u32 4294901760, %v557_v0  ;;  %v2369_v4 = vand.u32 4294901760, %v556_v1  ;;  %v2371_v5 = vand.u32 4294901760, %v555_v2  ;;  %v554_v6 = vld [vmem:[%s526_s27] sm:$0xff]  ;;  %v2435_v41 = vsub.f32 %v788_v15, %v2408_v25 }
  0x23   : > { %s513_s19 = scalar_lea.vmem %s2620_s0, %s2018_s23  ;;  %v2379_v8 = vand.u32 4294901760, %v554_v6  ;;  %v844_v47 = vsub.f32 %v787_v22, %v2416_v31  ;;  %v850_v51 = vsub.f32 %v786_v32, %v2437_v42  ;;  %v856_v54 = vsub.f32 %v785_v38, %v2440_v46  ;;  %s546_s23 = scalar_lea.vmem %s2598_s8, %s2347_s16  ;;  %v2104_v38 = vld [vmem:[%s2623_s3] ss:$0 sm:$0xff] }
  0x24   : > { %v551_v7 = vld [vmem:[%s513_s19 + $0x8] sm:$0xff]  ;;  %v550_v10 = vld [vmem:[%s513_s19] sm:$0xff]  ;;  %2023 = vmatpush.msra.mxu2 %v2367_v3  ;;  %v619_v11 = vsub.f32 %v557_v0, %v2367_v3  ;;  %v625_v13 = vsub.f32 %v556_v1, %v2369_v4  ;;  %v631_v14 = vsub.f32 %v555_v2, %v2371_v5  ;;  %582 = vmatpush.msra.mxu0 %v2367_v3  ;;  %s2607_s19 = sshll.u32 %s2350_s25, 3  ;;  %v839_v50 = vand.u32 4294901760, %v2435_v41  ;;  %s536_s0 = scalar_lea.vmem %s2595_s5, %s2353_s26 }
  0x25   : > { %v567_v9 = vsel %vm562_vm0, %v551_v7, 0  ;;  %v2395_v16 = vsub.f32 %v554_v6, %v2379_v8  ;;  %v564_v17 = vsel %vm562_vm0, %v550_v10, 0  ;;  %s517_s13 = scalar_lea.vmem %s2621_s1, %s2607_s19  ;;  %v845_v52 = vand.u32 4294901760, %v844_v47  ;;  %s2622_s1 = sshll.u32 %s2350_s25, 3  ;;  %v983_v7 = vld [vmem:[%s536_s0 + $0x10] sm:$0xff]  ;;  %v982_v10 = vld [vmem:[%s536_s0 + $0x8] sm:$0xff] }
  0x26   : > { %v2384_v12 = vand.u32 4294901760, %v567_v9  ;;  %2024 = vmatpush.msra.mxu2 %v2369_v4  ;;  %v620_v18 = vand.u32 4294901760, %v619_v11  ;;  %v626_v20 = vand.u32 4294901760, %v625_v13  ;;  %v632_v21 = vand.u32 4294901760, %v631_v14  ;;  %584 = vmatpush.msra.mxu0 %v2369_v4  ;;  %v552_v43 = vld [vmem:[%s517_s13] sm:$0xff]  ;;  %s549_s13 = scalar_lea.vmem %s2599_s9, %s2347_s16  ;;  %s521_s22 = scalar_lea.vmem %s2592_s2, %s2622_s1 }
  0x27   : > { %v638_v23 = vand.u32 4294901760, %v2395_v16  ;;  %v2406_v24 = vand.u32 4294901760, %v564_v17  ;;  %v794_v49 = vsel %vm562_vm0, %v552_v43, 0  ;;  %v840_v55 = vsub.f32 %v2435_v41, %v839_v50 }
  0x28   : > { %v2401_v19 = vsub.f32 %v567_v9, %v2384_v12  ;;  %2025 = vmatpush.msra.mxu2 %v2371_v5  ;;  %v621_v26 = vsub.f32 %v619_v11, %v620_v18  ;;  %v627_v28 = vsub.f32 %v625_v13, %v626_v20  ;;  %v633_v29 = vsub.f32 %v631_v14, %v632_v21 }
  0x29   : > { %586 = vmatpush.msra.mxu0 %v2371_v5  ;;  %v2414_v30 = vsub.f32 %v564_v17, %v2406_v24  ;;  %v639_v36 = vsub.f32 %v2395_v16, %v638_v23  ;;  %v2447_v53 = vand.u32 4294901760, %v794_v49  ;;  %v851_v56 = vand.u32 4294901760, %v850_v51 }
  0x2a   : > { %v599_v27 = vand.u32 4294901760, %v2401_v19  ;;  %2026 = vmatpush.msra.mxu2 %v2379_v8  ;;  %v622_v33 = vand.u32 4294901760, %v621_v26  ;;  %v628_v35 = vand.u32 4294901760, %v627_v28  ;;  %v634_v40 = vand.u32 4294901760, %v633_v29 }
  0x2b   : > { %588 = vmatpush.msra.mxu0 %v2379_v8  ;;  %v591_v37 = vand.u32 4294901760, %v2414_v30  ;;  %v640_v45 = vand.u32 4294901760, %v639_v36  ;;  %v846_v57 = vsub.f32 %v844_v47, %v845_v52  ;;  %v817_v58 = vsub.f32 %v794_v49, %v2447_v53 }
  0x2c   : > { %v600_v34 = vsub.f32 %v2401_v19, %v599_v27  ;;  %665 = vmatpush.msrb.mxu2 %v619_v11  ;;  %2027 = vmatpush.msra.mxu3 %v622_v33  ;;  %v857_v59 = vand.u32 4294901760, %v856_v54  ;;  %v841_v60 = vand.u32 4294901760, %v840_v55  ;;  %v852_v61 = vsub.f32 %v850_v51, %v851_v56  ;;  %v553_v11 = vld [vmem:[%s521_s22] sm:$0xff] }
  0x2d   : > { %734 = vmatpush.msrb.mxu0 %v620_v18  ;;  %623 = vmatpush.msra.mxu1 %v622_v33  ;;  %v592_v44 = vsub.f32 %v2414_v30, %v591_v37  ;;  %v847_v62 = vand.u32 4294901760, %v846_v57  ;;  %v818_v63 = vand.u32 4294901760, %v817_v58  ;;  %v1006_v9 = vand.u32 4294901760, %v983_v7  ;;  %v2105_v55 = vld [vmem:[%s546_s23] ss:$0 sm:$0xff]  ;;  %s2010_s23 = sshll.u32 %s2347_s16, 2 }
  0x2e   : > { %v601_v39 = vand.u32 4294901760, %v600_v34  ;;  %668 = vmatpush.msrb.mxu2 %v625_v13  ;;  %2028 = vmatpush.msra.mxu3 %v628_v35  ;;  %v858_v0 = vsub.f32 %v856_v54, %v857_v59  ;;  %v853_v1 = vand.u32 4294901760, %v852_v61  ;;  %v990_v15 = vsel %vm562_vm0, %v553_v11, 0  ;;  %s508_s16 = scalar_lea.vmem [#allocation2], %s2357_s12 }
  0x2f   : > { %738 = vmatpush.msrb.mxu0 %v626_v20  ;;  %629 = vmatpush.msra.mxu1 %v628_v35  ;;  %v593_v48 = vand.u32 4294901760, %v592_v44  ;;  %v819_v2 = vsub.f32 %v817_v58, %v818_v63  ;;  %v1040_v13 = vsub.f32 %v983_v7, %v1006_v9  ;;  %v1012_v17 = vand.u32 4294901760, %v990_v15 }
  0x30   : > { %602 = vmatmul.f32.vlgmr.msra.gmra.mxu2 %v601_v39  ;;  %2029 = vmatpush.msra.mxu3 %v634_v40 }
  0x31   : > { %671 = vmatpush.msrb.mxu2 %v631_v14  ;;  %742 = vmatpush.msrb.mxu0 %v632_v21  ;;  %v1008_v14 = vand.u32 4294901760, %v982_v10  ;;  %v1013_v22 = vsub.f32 %v990_v15, %v1012_v17 }
  0x32   : > { %635 = vmatpush.msra.mxu1 %v634_v40  ;;  %2030 = vmatpush.msra.mxu3 %v640_v45 }
  0x33   : > { %674 = vmatpush.msrb.mxu2 %v2395_v16  ;;  %594 = vmatmul.f32.vlgmr.msra.gmra.mxu0 %v593_v48  ;;  %v981_v16 = vld [vmem:[%s536_s0] sm:$0xff]  ;;  %v1046_v20 = vsub.f32 %v982_v10, %v1008_v14 }
  0x34   : > { %647 = vmatmul.f32.vlgmr.msra.gmra.mxu3 %v2384_v12  ;;  %641 = vmatpush.msra.mxu1 %v640_v45  ;;  %v1010_v21 = vand.u32 4294901760, %v981_v16 }
  0x35   : > { %699 = vmatpush.msrb.mxu3 %v2367_v3  ;;  %643 = vmatmul.f32.vlgmr.msra.gmra.mxu1 %v2406_v24 }
  0x36   : > { %769 = vmatpush.msrb.mxu1 %v2367_v3  ;;  %809 = vmatpush.msra.mxu2 %v2408_v25  ;;  %v859_v3 = vand.u32 4294901760, %v858_v0  ;;  %v1052_v26 = vsub.f32 %v981_v16, %v1010_v21 }
  0x37   : > { %701 = vmatpush.msrb.mxu3 %v2369_v4  ;;  %746 = vmatpush.msrb.mxu0 %v638_v23 }
  0x38   : > { %677 = vmatmul.f32.vlgmr.msrb.gmra.mxu2 %v2414_v30  ;;  %771 = vmatpush.msrb.mxu1 %v2369_v4  ;;  %v820_v4 = vand.u32 4294901760, %v819_v2  ;;  %v1053_v30 = vand.u32 4294901760, %v1052_v26 }
  0x39   : > { %811 = vmatpush.msra.mxu2 %v2416_v31  ;;  %703 = vmatpush.msrb.mxu3 %v2371_v5 }
  0x3a   : > { %773 = vmatpush.msrb.mxu1 %v2371_v5  ;;  %938 = vmatpush.msra.mxu0 %v839_v50  ;;  %v984_v5 = vld [vmem:[%s536_s0 + $0x18] sm:$0xff]  ;;  %v1054_v33 = vsub.f32 %v1052_v26, %v1053_v30 }
  0x3b   : > { %813 = vmatpush.msra.mxu2 %v2437_v42  ;;  %705 = vmatpush.msrb.mxu3 %v2379_v8  ;;  %v1004_v6 = vand.u32 4294901760, %v984_v5 }
  0x3c   : > { %748 = vmatmul.f32.vlgmr.msrb.gmra.mxu0 %v2406_v24  ;;  %709 = vmatmul.f32.vlgmr.msrb.gmra.mxu3 %v591_v37  ;;  %v1055_v35 = vand.u32 4294901760, %v1054_v33 }
  0x3d   : > { %775 = vmatpush.msrb.mxu1 %v2379_v8  ;;  %842 = vmatpush.msra.mxu3 %v841_v60  ;;  %v1034_v8 = vsub.f32 %v984_v5, %v1004_v6 }
  0x3e   : > { %815 = vmatpush.msra.mxu2 %v2440_v46  ;;  %777 = vmatmul.f32.vlgmr.msrb.gmra.mxu1 %v2406_v24 }
  0x3f   : > { %848 = vmatpush.msra.mxu3 %v847_v62  ;;  %969 = vmatpush.msra.mxu1 %v2408_v25 }
  0x40   : > { %880 = vmatpush.msrb.mxu2 %v2435_v41  ;;  %942 = vmatpush.msra.mxu0 %v845_v52 }
  0x41   : > { %682 = vmatmul.f32.gmra.mxu2 %v2401_v19  ;;  %854 = vmatpush.msra.mxu3 %v853_v1  ;;  %v1041_v19 = vand.u32 4294901760, %v1040_v13 }
  0x42   : > { %883 = vmatpush.msrb.mxu2 %v844_v47  ;;  %971 = vmatpush.msra.mxu1 %v2416_v31 }
  0x43   : > { %860 = vmatpush.msra.mxu3 %v859_v3  ;;  %946 = vmatpush.msra.mxu0 %v851_v56  ;;  %v1042_v24 = vsub.f32 %v1040_v13, %v1041_v19 }
  0x44   : > { %886 = vmatpush.msrb.mxu2 %v850_v51  ;;  %752 = vmatmul.f32.gmra.mxu0 %v2384_v12 }
  0x45   : > { %715 = vmatmul.f32.gmra.mxu3 %v599_v27  ;;  %950 = vmatpush.msra.mxu0 %v857_v59  ;;  %v1014_v27 = vand.u32 4294901760, %v1013_v22  ;;  %v1043_v28 = vand.u32 4294901760, %v1042_v24 }
  0x46   : > { %889 = vmatpush.msrb.mxu2 %v856_v54  ;;  %909 = vmatpush.msrb.mxu3 %v2408_v25  ;;  %v1047_v25 = vand.u32 4294901760, %v1046_v20 }
  0x47   : > { %781 = vmatmul.f32.gmra.mxu1 %v2384_v12  ;;  %v1035_v12 = vand.u32 4294901760, %v1034_v8  ;;  %1076 = vmatpush.msrb.mxu0 %v1034_v8 }
  0x48   : > { %911 = vmatpush.msrb.mxu3 %v2416_v31  ;;  %973 = vmatpush.msra.mxu1 %v2437_v42  ;;  %v1048_v29 = vsub.f32 %v1046_v20, %v1047_v25  ;;  %v1015_v31 = vsub.f32 %v1013_v22, %v1014_v27 }
  0x49   : > { %821 = vmatmul.f32.vlgmr.msra.gmra.mxu2 %v820_v4  ;;  %v1036_v18 = vsub.f32 %v1034_v8, %v1035_v12  ;;  %1079 = vmatpush.msrb.mxu0 %v1040_v13 }
  0x4a   : > { %913 = vmatpush.msrb.mxu3 %v2437_v42  ;;  %975 = vmatpush.msra.mxu1 %v2440_v46  ;;  %v1049_v32 = vand.u32 4294901760, %v1048_v29  ;;  %v1016_v34 = vand.u32 4294901760, %v1015_v31 }
  0x4b   : > { %1005 = vmatpush.msra.mxu2 %v1004_v6  ;;  %v1037_v23 = vand.u32 4294901760, %v1036_v18  ;;  %1082 = vmatpush.msrb.mxu0 %v1046_v20 }
  0x4c   : > { %915 = vmatpush.msrb.mxu3 %v2440_v46  ;;  %952 = vmatmul.f32.vlgmr.msra.gmra.mxu0 %v2447_v53 }
  0x4d   : > { %862 = vmatmul.f32.vlgmr.msra.gmra.mxu3 %v2447_v53  ;;  %1105 = vmatpush.msrb.mxu1 %v1004_v6 }
  0x4e   : > { %1007 = vmatpush.msra.mxu2 %v1006_v9  ;;  %1038 = vmatpush.msra.mxu3 %v1037_v23 }
  0x4f   : > { %977 = vmatmul.f32.vlgmr.msra.gmra.mxu1 %v2447_v53  ;;  %1085 = vmatpush.msrb.mxu0 %v1052_v26 }
  0x50   : > { %1107 = vmatpush.msrb.mxu1 %v1006_v9  ;;  %1009 = vmatpush.msra.mxu2 %v1008_v14 }
  0x51   : > { %892 = vmatmul.f32.vlgmr.msrb.gmra.mxu2 %v817_v58  ;;  %1044 = vmatpush.msra.mxu3 %v1043_v28  ;;  %v2106_v28 = vld [vmem:[%s549_s13] ss:$0 sm:$0xff]  ;;  %s540_s13 = scalar_lea.vmem %s2596_s6, %s2010_s23 }
  0x52   : > { %1109 = vmatpush.msrb.mxu1 %v1008_v14  ;;  %1011 = vmatpush.msra.mxu2 %v1010_v21 }
  0x53   : > { %1050 = vmatpush.msra.mxu3 %v1049_v32 }
  0x54   : > { %1134 = vmatpush.msrb.mxu2 %v1035_v12  ;;  %1111 = vmatpush.msrb.mxu1 %v1010_v21 }
  0x55   : > { %919 = vmatmul.f32.vlgmr.msrb.gmra.mxu3 %v818_v63  ;;  %1088 = vmatmul.f32.vlgmr.msrb.gmra.mxu0 %v1013_v22 }
  0x56   : > { %1138 = vmatpush.msrb.mxu2 %v1041_v19  ;;  %1056 = vmatpush.msra.mxu3 %v1055_v35 }
  0x57   : > { %1115 = vmatmul.f32.vlgmr.msrb.gmra.mxu1 %v1014_v27 }
  0x58   : > { %1142 = vmatpush.msrb.mxu2 %v1047_v25  ;;  %1165 = vmatpush.msrb.mxu3 %v1004_v6 }
  0x59   : > { %1017 = vmatmul.f32.vlgmr.msra.gmra.mxu2 %v1016_v34 }
  0x5a   : > { %1146 = vmatpush.msrb.mxu2 %v1053_v30  ;;  %1167 = vmatpush.msrb.mxu3 %v1006_v9 }
  0x5c   : > { %1169 = vmatpush.msrb.mxu3 %v1008_v14 }
  0x5d   : > { %1058 = vmatmul.f32.vlgmr.msra.gmra.mxu3 %v1012_v17 }
  0x5e   : > { %1171 = vmatpush.msrb.mxu3 %v1010_v21 }
  0x61   : > { %1148 = vmatmul.f32.vlgmr.msrb.gmra.mxu2 %v1012_v17 }
  0x65   : > { %1173 = vmatmul.f32.vlgmr.msrb.gmra.mxu3 %v1012_v17 }
  0xb0   : > { %v595_v37 = vpop.f32.mrf.mxu0 }
  0xb1   : > { %v596_v40 = vadd.f32 %v2104_v38, %v595_v37 }
  0xb2   : > { %v644_v41 = vpop.f32.mrf.mxu1 }
  0xb3   : > { %v603_v36 = vpop.f32.mrf.mxu2  ;;  %v645_v43 = vadd.f32 %v644_v41, %v596_v40 }
  0xb4   : > { %v604_v48 = vadd.f32 %v2104_v38, %v603_v36 }
  0xb7   : > { %v648_v39 = vpop.f32.mrf.mxu3 }
  0xb8   : > { %v649_v51 = vadd.f32 %v648_v39, %v604_v48 }
  0xb9   : > { %v749_v47 = vpop.f32.mrf.mxu0 }
  0xbb   : > { %v678_v42 = vpop.f32.mrf.mxu2  ;;  %v778_v50 = vpop.f32.mrf.mxu1 }
  0xbc   : > { %v679_v44 = vadd.f32 %v678_v42, %v645_v43 }
  0xbf   : > { %v710_v45 = vpop.f32.mrf.mxu3 }
  0xc0   : > { %v711_v49 = vadd.f32 %v710_v45, %v679_v44 }
  0xc1   : > { %v753_v59 = vpop.f32.mrf.mxu0 }
  0xc2   : > { %v750_v52 = vadd.f32 %v749_v47, %v711_v49 }
  0xc4   : > { %v683_v46 = vpop.f32.mrf.mxu2  ;;  %v779_v57 = vadd.f32 %v778_v50, %v750_v52  ;;  %v782_v0 = vpop.f32.mrf.mxu1 }
  0xc5   : > { %v684_v54 = vadd.f32 %v683_v46, %v649_v51 }
  0xc6   : > { %v1179_v61 = vsel %vm1177_vm1, %v779_v57, 0 }
  0xc7   : > { %v1204_v1 = vand.u32 4294901760, %v1179_v61 }
  0xc8   : > { %v716_v53 = vpop.f32.mrf.mxu3 }
  0xc9   : > { %v717_v58 = vadd.f32 %v716_v53, %v684_v54  ;;  %v1205_v5 = vsub.f32 %v1179_v61, %v1204_v1  ;;  %v953_v9 = vpop.f32.mrf.mxu0 }
  0xcb   : > { %v754_v62 = vadd.f32 %v753_v59, %v717_v58  ;;  %v1206_v12 = vand.u32 4294901760, %v1205_v5 }
  0xcc   : > { %v822_v56 = vpop.f32.mrf.mxu2  ;;  %v978_v11 = vpop.f32.mrf.mxu1 }
  0xcd   : > { %v823_v60 = vadd.f32 %v2105_v55, %v822_v56  ;;  %v783_v3 = vadd.f32 %v782_v0, %v754_v62  ;;  %v1207_v18 = vsub.f32 %v1205_v5, %v1206_v12 }
  0xcf   : > { %v1182_v7 = vsel %vm1177_vm1, %v783_v3, 0  ;;  %v1208_v21 = vand.u32 4294901760, %v1207_v18 }
  0xd0   : > { %v863_v63 = vpop.f32.mrf.mxu3  ;;  %v1212_v13 = vand.u32 4294901760, %v1182_v7 }
  0xd1   : > { %v864_v2 = vadd.f32 %v863_v63, %v823_v60 }
  0xd2   : > { %v1213_v16 = vsub.f32 %v1182_v7, %v1212_v13  ;;  %v1089_v32 = vpop.f32.mrf.mxu0 }
  0xd4   : > { %v893_v4 = vpop.f32.mrf.mxu2  ;;  %v1214_v22 = vand.u32 4294901760, %v1213_v16  ;;  %v1116_v34 = vpop.f32.mrf.mxu1 }
  0xd5   : > { %v894_v6 = vadd.f32 %v893_v4, %v864_v2 }
  0xd6   : > { %v1215_v25 = vsub.f32 %v1213_v16, %v1214_v22 }
  0xd8   : > { %v920_v8 = vpop.f32.mrf.mxu3  ;;  %v1216_v27 = vand.u32 4294901760, %v1215_v25 }
  0xd9   : > { %v921_v10 = vadd.f32 %v920_v8, %v894_v6 }
  0xdb   : > { %v954_v14 = vadd.f32 %v953_v9, %v921_v10 }
  0xdc   : > { %v1018_v29 = vpop.f32.mrf.mxu2 }
  0xdd   : > { %v979_v15 = vadd.f32 %v978_v11, %v954_v14  ;;  %v1019_v30 = vadd.f32 %v2106_v28, %v1018_v29 }
  0xdf   : > { %v1185_v17 = vsel %vm1177_vm1, %v979_v15, 0 }
  0xe0   : > { %v1202_v19 = vand.u32 4294901760, %v1185_v17  ;;  %v1059_v31 = vpop.f32.mrf.mxu3 }
  0xe1   : > { %v1060_v33 = vadd.f32 %v1059_v31, %v1019_v30 }
  0xe2   : > { %v1237_v20 = vsub.f32 %v1185_v17, %v1202_v19  ;;  %1203 = vmatpush.xpose.msra.mxu0 %v1202_v19  ;;  %1296 = vmatpush.xpose.msra.mxu3 %v1202_v19 }
  0xe3   : > { %v1090_v35 = vadd.f32 %v1089_v32, %v1060_v33 }
  0xe4   : > { %1268 = vmatpush.xpose.msra.mxu2 %v1237_v20  ;;  %v1238_v23 = vand.u32 4294901760, %v1237_v20  ;;  %v1149_v37 = vpop.f32.mrf.mxu2 }
  0xe5   : > { %1209 = vmatmul.f32.vlgmr.msra.gmra.mxu0 %v1208_v21  ;;  %1300 = vmatmul.f32.vlgmr.msra.gmra.mxu3 %v1206_v12  ;;  %v1117_v36 = vadd.f32 %v1116_v34, %v1090_v35 }
  0xe6   : > { %1328 = vmatpush.xpose.msrb.mxu0 %v1238_v23  ;;  %v1239_v24 = vsub.f32 %v1237_v20, %v1238_v23 }
  0xe7   : > { %1271 = vmatmul.f32.vlgmr.msra.gmra.mxu2 %v1205_v5  ;;  %v1150_v38 = vadd.f32 %v1149_v37, %v1117_v36 }
  0xe8   : > { %v1240_v26 = vand.u32 4294901760, %v1239_v24  ;;  %v1174_v39 = vpop.f32.mrf.mxu3 }
  0xe9   : > { %v1175_v40 = vadd.f32 %v1174_v39, %v1150_v38 }
  0xea   : > { %1241 = vmatpush.xpose.msra.mxu1 %v1240_v26 }
  0xeb   : > { %v1434_v41 = vand.u32 4294901760, %v1175_v40 }
  0xed   : > { %1217 = vmatmul.f32.gmra.mxu0 %v1216_v27  ;;  %1243 = vmatmul.f32.vlgmr.msra.gmra.mxu1 %v1204_v1  ;;  %v1469_v42 = vsub.f32 %v1175_v40, %v1434_v41 }
  0xee   : > { %1354 = vmatpush.xpose.msrb.mxu1 %v1202_v19  ;;  %1306 = vmatmul.f32.gmra.mxu3 %v1214_v22 }
  0xef   : > { %1276 = vmatmul.f32.gmra.mxu2 %v1213_v16  ;;  %v1470_v43 = vand.u32 4294901760, %v1469_v42  ;;  %1500 = vmatpush.msra.mxu0 %v1469_v42 }
  0xf0   : > { %1435 = vmatpush.msrb.mxu2 %v1434_v41 }
  0xf1   : > { %v1471_v44 = vsub.f32 %v1469_v42, %v1470_v43 }
  0xf2   : > { %1528 = vmatpush.msra.mxu1 %v1434_v41  ;;  %1560 = vmatpush.msra.mxu2 %v1470_v43 }
  0xf3   : > { %v1472_v45 = vand.u32 4294901760, %v1471_v44 }
  0xf5   : > { %1247 = vmatmul.f32.gmra.mxu1 %v1212_v13  ;;  %1330 = vmatmul.f32.vlgmr.msrb.gmra.mxu0 %v1204_v1 }
  0xf6   : > { %1473 = vmatpush.msrb.mxu3 %v1472_v45 }
  0xf8   : > { %1586 = vmatpush.msra.mxu3 %v1434_v41 }
  0xfd   : > { %1334 = vmatmul.f32.gmra.mxu0 %v1212_v13  ;;  %1356 = vmatmul.f32.vlgmr.msrb.gmra.mxu1 %v1204_v1 }
 0x105   : > { %1360 = vmatmul.f32.gmra.mxu1 %v1212_v13 }
 0x162   : > { %v1210_v46 = vpop.f32.mrf.mxu0 }
 0x168   : > { %v1301_v53 = vpop.f32.mrf.mxu3 }
 0x16a   : > { %v1218_v47 = vpop.f32.mrf.mxu0  ;;  %v1244_v48 = vpop.f32.mrf.mxu1 }
 0x16b   : > { %v1245_v49 = vadd.f32 %v1244_v48, %v1210_v46  ;;  %v1272_v50 = vpop.f32.mrf.mxu2 }
 0x16d   : > { %v1273_v52 = vadd.f32 %v1272_v50, %v1245_v49 }
 0x16f   : > { %v1302_v56 = vadd.f32 %v1301_v53, %v1273_v52  ;;  %v1596_v52 = vld [vmem:[%s540_s13] sm:$0xf] }
 0x170   : > { %v1605_v53 = vsel %vm1603_vm11, %v1596_v52, 0 }
 0x171   : > { %v1307_v63 = vpop.f32.mrf.mxu3 }
 0x172   : > { %v1248_v51 = vpop.f32.mrf.mxu1  ;;  %v1331_v54 = vpop.f32.mrf.mxu0 }
 0x173   : > { %v1249_v55 = vadd.f32 %v1248_v51, %v1218_v47  ;;  %v1332_v57 = vadd.f32 %v1331_v54, %v1302_v56  ;;  %v1277_v58 = vpop.f32.mrf.mxu2  ;;  %v1622_v54 = vand.u32 4294901760, %v1605_v53 }
 0x175   : > { %v1278_v60 = vadd.f32 %v1277_v58, %v1249_v55  ;;  %1623 = vmatpush.msrb.mxu0 %v1622_v54  ;;  %v1657_v55 = vsub.f32 %v1605_v53, %v1622_v54 }
 0x177   : > { %v1308_v1 = vadd.f32 %v1307_v63, %v1278_v60  ;;  %v1658_v56 = vand.u32 4294901760, %v1657_v55 }
 0x17a   : > { %v1357_v59 = vpop.f32.mrf.mxu1  ;;  %v1335_v0 = vpop.f32.mrf.mxu0 }
 0x17b   : > { %v1358_v61 = vadd.f32 %v1357_v59, %v1332_v57  ;;  %v1336_v2 = vadd.f32 %v1335_v0, %v1308_v1  ;;  %v1659_v57 = vsub.f32 %v1657_v55, %v1658_v56 }
 0x17d   : > { %v1365_v62 = vsel %vm1364_vm2, %v1358_v61, -inf  ;;  %v1660_v58 = vand.u32 4294901760, %v1659_v57 }
 0x17e   : > { %1366 = vmax.xlane.f32.xlu0 %v1365_v62 }
 0x17f   : > { %1661 = vmatpush.msrb.mxu1 %v1660_v58 }
 0x182   : > { %v1361_v3 = vpop.f32.mrf.mxu1 }
 0x183   : > { %v1362_v4 = vadd.f32 %v1361_v3, %v1336_v2 }
 0x185   : > { %v1368_v5 = vsel %vm1364_vm2, %v1362_v4, -inf }
 0x186   : > { %1369 = vmax.xlane.f32.xlu0 %v1368_v5 }
 0x1f1   : > { %v1367_v6 = vpop.xlane.xlu0 %1366 }
 0x1f2   : > { %v1371_v7 = vsub.f32 %v1358_v61, %v1367_v6 }
 0x1f4   : > { %v1373_v8 = vmul.f32 1.442695, %v1371_v7 }
 0x1f6   : > { %2107 = vpow2.f32 %v1373_v8 }
 0x1f9   : > { %v1370_v9 = vpop.xlane.xlu0 %1369 }
 0x1fa   : > { %v1372_v10 = vsub.f32 %v1362_v4, %v1370_v9 }
 0x1fc   : > { %v2108_v11 = vpop.eup %2107  ;;  %v1375_v12 = vmul.f32 1.442695, %v1372_v10 }
 0x1fd   : > { %v1377_v13 = vsel %vm1364_vm2, %v2108_v11, 0.0 }
 0x1fe   : > { %2109 = vpow2.f32 %v1375_v12  ;;  %1378 = vadd.xlane.f32.xlu1 %v1377_v13 }
 0x204   : > { %v2110_v14 = vpop.eup %2109 }
 0x205   : > { %v1380_v15 = vsel %vm1364_vm2, %v2110_v14, 0.0 }
 0x206   : > { %1381 = vadd.xlane.f32.xlu1 %v1380_v15 }
 0x271   : > { %v1379_v16 = vpop.xlane.xlu1 %1378 }
 0x272   : > { %2111 = vrcp.f32 %v1379_v16  ;;  %v1394_v21 = vand.u32 2147483648, %v1379_v16  ;;  %v1392_v23 = vand.u32 2147483647, %v1379_v16  ;;  %vm1388_vm4 = vweird.f32 %v1379_v16 }
 0x274   : > { %v1395_v26 = vor.u32 1.1754944e-38, %v1394_v21  ;;  %vm1393_vm6 = vcmp.eq.f32.partialorder %v1392_v23, 8.507059e+37 }
 0x278   : > { %v2112_v17 = vpop.eup %2111 }
 0x279   : > { %v1384_v18 = vmul.f32 %v2112_v17, %v1379_v16  ;;  %v1382_v19 = vpop.xlane.xlu1 %1381  ;;  %vm1389_vm3 = vweird.f32 %v2112_v17 }
 0x27a   : > { %2113 = vrcp.f32 %v1382_v19  ;;  %vm1390_vm5 = vmor %vm1388_vm4, %vm1389_vm3  ;;  %v1409_v32 = vand.u32 2147483648, %v1382_v19  ;;  %v1407_v34 = vand.u32 2147483647, %v1382_v19  ;;  %vm1403_vm8 = vweird.f32 %v1382_v19 }
 0x27b   : > { %v1385_v20 = vsub.f32 1.0, %v1384_v18 }
 0x27c   : > { %v1410_v38 = vor.u32 1.1754944e-38, %v1409_v32  ;;  %vm1408_vm10 = vcmp.eq.f32.partialorder %v1407_v34, 8.507059e+37 }
 0x27d   : > { %v1386_v22 = vmul.f32 %v2112_v17, %v1385_v20 }
 0x27f   : > { %v1387_v24 = vadd.f32 %v2112_v17, %v1386_v22 }
 0x280   : > { %v2114_v25 = vpop.eup %2113 }
 0x281   : > { %v1391_v27 = vsel %vm1390_vm5, %v2112_v17, %v1387_v24  ;;  %v1399_v28 = vmul.f32 %v2114_v25, %v1382_v19  ;;  %vm1404_vm7 = vweird.f32 %v2114_v25 }
 0x282   : > { %v1396_v29 = vsel %vm1393_vm6, %v1395_v26, %v1391_v27  ;;  %vm1405_vm9 = vmor %vm1403_vm8, %vm1404_vm7 }
 0x283   : > { %v1400_v30 = vsub.f32 1.0, %v1399_v28  ;;  %v1397_v31 = vmul.f32 %v2108_v11, %v1396_v29 }
 0x285   : > { %v1401_v33 = vmul.f32 %v2114_v25, %v1400_v30  ;;  %v1414_v35 = vsel %vm1364_vm2, %v1397_v31, 0 }
 0x286   : > { %v1436_v36 = vand.u32 4294901760, %v1414_v35 }
 0x287   : > { %v1402_v37 = vadd.f32 %v2114_v25, %v1401_v33 }
 0x288   : > { %1475 = vmatmul.f32.vlgmr.msrb.gmra.mxu3 %v1436_v36  ;;  %v1437_v39 = vsub.f32 %v1414_v35, %v1436_v36 }
 0x289   : > { %v1406_v40 = vsel %vm1405_vm9, %v2114_v25, %v1402_v37  ;;  %1716 = vmatpush.msrb.mxu3 %v1622_v54 }
 0x28a   : > { %v1411_v41 = vsel %vm1408_vm10, %v1410_v38, %v1406_v40  ;;  %1503 = vmatmul.f32.vlgmr.msra.gmra.mxu0 %v1437_v39  ;;  %v1438_v42 = vand.u32 4294901760, %v1437_v39 }
 0x28b   : > { %v1412_v43 = vmul.f32 %v2110_v14, %v1411_v41  ;;  %1748 = vmatpush.msra.mxu0 %v1658_v56 }
 0x28c   : > { %1532 = vmatmul.f32.vlgmr.msra.gmra.mxu1 %v1438_v42  ;;  %v1439_v44 = vsub.f32 %v1437_v39, %v1438_v42 }
 0x28d   : > { %v1417_v45 = vsel %vm1364_vm2, %v1412_v43, 0  ;;  %1774 = vmatpush.msra.mxu1 %v1622_v54 }
 0x28e   : > { %v1440_v46 = vand.u32 4294901760, %v1439_v44  ;;  %v1444_v47 = vand.u32 4294901760, %v1417_v45 }
 0x290   : > { %1441 = vmatmul.f32.vlgmr.msrb.gmra.mxu2 %v1440_v46  ;;  %1479 = vmatmul.f32.gmra.mxu3 %v1444_v47  ;;  %v1445_v48 = vsub.f32 %v1417_v45, %v1444_v47 }
 0x291   : > { %1688 = vmatpush.msrb.mxu2 %v1657_v55 }
 0x292   : > { %1508 = vmatmul.f32.gmra.mxu0 %v1445_v48  ;;  %v1446_v49 = vand.u32 4294901760, %v1445_v48 }
 0x294   : > { %1538 = vmatmul.f32.gmra.mxu1 %v1446_v49  ;;  %v1447_v50 = vsub.f32 %v1445_v48, %v1446_v49 }
 0x296   : > { %v1448_v51 = vand.u32 4294901760, %v1447_v50 }
 0x298   : > { %1449 = vmatmul.f32.gmra.mxu2 %v1448_v51  ;;  %1588 = vmatmul.f32.vlgmr.msra.gmra.mxu3 %v1436_v36 }
 0x2a0   : > { %1562 = vmatmul.f32.vlgmr.msra.gmra.mxu2 %v1436_v36  ;;  %1592 = vmatmul.f32.gmra.mxu3 %v1444_v47 }
 0x2a8   : > { %1566 = vmatmul.f32.gmra.mxu2 %v1444_v47 }
 0x307   : > { %v1504_v63 = vpop.f32.mrf.mxu0 }
 0x309   : > { %v1533_v2 = vpop.f32.mrf.mxu1 }
 0x30b   : > { %v1476_v59 = vpop.f32.mrf.mxu3 }
 0x30f   : > { %v1509_v8 = vpop.f32.mrf.mxu0 }
 0x311   : > { %v1539_v12 = vpop.f32.mrf.mxu1 }
 0x313   : > { %v1442_v60 = vpop.f32.mrf.mxu2  ;;  %v1480_v61 = vpop.f32.mrf.mxu3 }
 0x314   : > { %v1477_v62 = vadd.f32 %v1476_v59, %v1442_v60 }
 0x316   : > { %v1505_v1 = vadd.f32 %v1504_v63, %v1477_v62 }
 0x318   : > { %v1534_v4 = vadd.f32 %v1533_v2, %v1505_v1 }
 0x31b   : > { %v1450_v0 = vpop.f32.mrf.mxu2  ;;  %v1589_v5 = vpop.f32.mrf.mxu3 }
 0x31c   : > { %v1481_v3 = vadd.f32 %v1480_v61, %v1450_v0 }
 0x31e   : > { %v1510_v9 = vadd.f32 %v1509_v8, %v1481_v3 }
 0x320   : > { %v1540_v14 = vadd.f32 %v1539_v12, %v1510_v9 }
 0x323   : > { %v1563_v6 = vpop.f32.mrf.mxu2  ;;  %v1593_v18 = vpop.f32.mrf.mxu3 }
 0x324   : > { %v1564_v7 = vadd.f32 %v1563_v6, %v1534_v4 }
 0x326   : > { %v1590_v10 = vadd.f32 %v1589_v5, %v1564_v7 }
 0x328   : > { %v1598_v11 = vsel %vm1177_vm1, %v1590_v10, 0 }
 0x329   : > { %v1624_v13 = vand.u32 4294901760, %v1598_v11 }
 0x32b   : > { %v1625_v15 = vsub.f32 %v1598_v11, %v1624_v13  ;;  %v1567_v16 = vpop.f32.mrf.mxu2  ;;  %1663 = vmatmul.f32.vlgmr.msrb.gmra.mxu1 %v1624_v13 }
 0x32c   : > { %v1568_v17 = vadd.f32 %v1567_v16, %v1540_v14 }
 0x32d   : > { %1691 = vmatmul.f32.vlgmr.msrb.gmra.mxu2 %v1625_v15  ;;  %v1626_v19 = vand.u32 4294901760, %v1625_v15 }
 0x32e   : > { %v1594_v20 = vadd.f32 %v1593_v18, %v1568_v17 }
 0x32f   : > { %1720 = vmatmul.f32.vlgmr.msrb.gmra.mxu3 %v1626_v19  ;;  %v1627_v21 = vsub.f32 %v1625_v15, %v1626_v19 }
 0x330   : > { %v1601_v22 = vsel %vm1177_vm1, %v1594_v20, 0 }
 0x331   : > { %v1632_v23 = vand.u32 4294901760, %v1601_v22  ;;  %v1628_v24 = vand.u32 4294901760, %v1627_v21 }
 0x333   : > { %1629 = vmatmul.f32.vlgmr.msrb.gmra.mxu0 %v1628_v24  ;;  %1667 = vmatmul.f32.gmra.mxu1 %v1632_v23  ;;  %v1633_v25 = vsub.f32 %v1601_v22, %v1632_v23 }
 0x335   : > { %1696 = vmatmul.f32.gmra.mxu2 %v1633_v25  ;;  %v1634_v26 = vand.u32 4294901760, %v1633_v25 }
 0x337   : > { %1726 = vmatmul.f32.gmra.mxu3 %v1634_v26  ;;  %v1635_v27 = vsub.f32 %v1633_v25, %v1634_v26 }
 0x339   : > { %v1636_v28 = vand.u32 4294901760, %v1635_v27 }
 0x33b   : > { %1637 = vmatmul.f32.gmra.mxu0 %v1636_v28  ;;  %1776 = vmatmul.f32.vlgmr.msra.gmra.mxu1 %v1624_v13 }
 0x343   : > { %1750 = vmatmul.f32.vlgmr.msra.gmra.mxu0 %v1624_v13  ;;  %1780 = vmatmul.f32.gmra.mxu1 %v1632_v23 }
 0x34b   : > { %1754 = vmatmul.f32.gmra.mxu0 %v1632_v23 }
 0x3a8   : > { %v1664_v29 = vpop.f32.mrf.mxu1 }
 0x3b0   : > { %v1630_v30 = vpop.f32.mrf.mxu0  ;;  %v1668_v31 = vpop.f32.mrf.mxu1 }
 0x3b1   : > { %v1665_v32 = vadd.f32 %v1664_v29, %v1630_v30  ;;  %v1692_v33 = vpop.f32.mrf.mxu2 }
 0x3b2   : > { %v1721_v36 = vpop.f32.mrf.mxu3 }
 0x3b3   : > { %v1693_v35 = vadd.f32 %v1692_v33, %v1665_v32 }
 0x3b5   : > { %v1722_v37 = vadd.f32 %v1721_v36, %v1693_v35 }
 0x3b8   : > { %v1638_v34 = vpop.f32.mrf.mxu0  ;;  %v1777_v39 = vpop.f32.mrf.mxu1 }
 0x3b9   : > { %v1669_v38 = vadd.f32 %v1668_v31, %v1638_v34  ;;  %v1697_v42 = vpop.f32.mrf.mxu2 }
 0x3ba   : > { %v1727_v45 = vpop.f32.mrf.mxu3 }
 0x3bb   : > { %v1698_v43 = vadd.f32 %v1697_v42, %v1669_v38 }
 0x3bd   : > { %v1728_v46 = vadd.f32 %v1727_v45, %v1698_v43 }
 0x3c0   : > { %v1751_v40 = vpop.f32.mrf.mxu0  ;;  %v1781_v49 = vpop.f32.mrf.mxu1 }
 0x3c1   : > { %v1752_v41 = vadd.f32 %v1751_v40, %v1722_v37 }
 0x3c3   : > { %v1778_v44 = vadd.f32 %v1777_v39, %v1752_v41 }
 0x3c7   : > { %1787 = sbr.rel (%p2011_p0) target bundleno = 977 (0x3d1), region = 68 }
 0x3c8   : > { %v1755_v47 = vpop.f32.mrf.mxu0 }
 0x3c9   : > { %v1756_v48 = vadd.f32 %v1755_v47, %v1728_v46 }
 0x3cb   : > { %v1782_v50 = vadd.f32 %v1781_v49, %v1756_v48 }
 0x3cc   : > { %v2115_v51 = vld [vmem:[%s2600_s10] ss:$0 sm:$0xff] }
 0x3cd   : > { %v1792_v52 = vadd.f32 %v2115_v51, %v1778_v44  ;;  %v1793_v53 = vadd.f32 %v2115_v51, %v1782_v50 }
 0x3cf   : > { %1794 = vst.msk [vmem:[%s508_s16] sm:$0xff] %vm562_vm0, %v1792_v52 }
 0x3d0   : > { %1795 = vst.msk [vmem:[%s508_s16 + $0x8] sm:$0xff] %vm562_vm0, %v1793_v53 }
 0x3d1 PF: > { %p2012_p1 = scmp.eq.s32.totalorder %s2194_s20, 0 }
 0x3d3   : > { %1799 = sbr.rel (%p2012_p1) target bundleno = 989 (0x3dd), region = 72 }
 0x3d8   : > { %v1800_v54 = vld [vmem:[%s508_s16] sm:$0xff]  ;;  %v1801_v55 = vld [vmem:[%s508_s16 + $0x8] sm:$0xff] }
 0x3d9   : > { %v1802_v56 = vadd.f32 %v1800_v54, %v1778_v44  ;;  %v1803_v57 = vadd.f32 %v1801_v55, %v1782_v50 }
 0x3db   : > { %1804 = vst.msk [vmem:[%s508_s16] sm:$0xff] %vm562_vm0, %v1802_v56 }
 0x3dc   : > { %1805 = vst.msk [vmem:[%s508_s16 + $0x8] sm:$0xff] %vm562_vm0, %v1803_v57 }
 0x3dd PF: > { %s2022_s12 = sshll.u32 %s2198_s21, 4  ;;  %s1819_s25 = sshll.u32 %s508_s16, 4  ;;  %s1820_s25 = int_to_ptr.vmem [resolvable:$true] %s1819_s25 }
 0x3de   : > { %s1818_s3 = scalar_lea.hbm %s2601_s11, %s2022_s12  ;;  %s2624_s26 = sand.u32 1, %s2186_s18  }
 0x3df   : > { %s1821_s20 = sshll.u32 %s1818_s3, 4  ;;  %s1807_s27 = scalar_lea.sflag [#allocation3], %s2624_s26  ;;  %s1822_s20 = int_to_ptr.hbm [resolvable:$true] %s1821_s20 }
 0x3e0   : > { %s2130_s19 = sshra.s32 %s1822_s20, 4  ;;  %s2136_s21 = scalar_lea.hbm %s2601_s11, 32  ;;  %s2131_s19 = int_to_ptr.hbm [resolvable:$true] %s2130_s19 }
 0x3e1   : > { %s2132_s23 = scalar_lea.hbm %s2131_s19, 16  ;;  %p2137_p6 = scmp.lt.s32.totalorder %s2131_s19, %s2601_s11 }
 0x3e2   : > { %p2133_p2 = scmp.ne.s32.totalorder %s2131_s19, %s2132_s23  ;;  %p2138_p7 = scmp.lt.s32.totalorder %s2136_s21, %s2132_s23 }
 0x3e4   : > { %p2134_p4 = pnand %p2133_p2, %p2323_p3  ;;  %p2139_p8 = por %p2138_p7, %p2137_p6 }
 0x3e6   : > { %p2135_p5 = pneg %p2134_p4 }
 0x3e8   : > { %p2140_p10 = pnand %p2139_p8, %p2135_p5 }
 0x3ea   : > { %2143 = shalt.err (!%p2140_p10)
}
 0x3eb   : > { %s2212_s16 = smov 128   ;;  %s2213_s22 = smov 8  }
 0x3ec   : > { %2031 = dma.vmem_to_hbm [thread:$0]  (%p2323_p3), %s1820_s25, 256, %s1822_s20, %s1807_s27, %s2212_s16, %s2212_s16, %s2213_s22  }
 0x3ed PF: > { %p2037_p11 = scmp.ge.s32.totalorder %s2210_s24, 2  ;;  %s1836_s12 = sand.u32 1, %s2182_s17  }
 0x3ee   : > { %s1837_s0 = scalar_lea.sflag [#allocation3], %s1836_s12 }
 0x3ef   : > { %p2034_p12 = pnand %p2037_p11, %p2333_p9 }
 0x3f1   : > { %p2035_p13 = pneg %p2034_p12 }
 0x3f3   : > { %2177 = dma.done.wait (%p2035_p13), %s1837_s0, 256  }
 0x3f4   : > { %2179 = vsyncadd (%p2035_p13), %s1837_s0, 4294967040  ;;  %s24_s24 = sadd.s32 1, %s2210_s24   ;;  %s2625_s1 = sld [smem:[#allocation5_spill]] }
 0x3f5   : > { %p21_p0 = scmp.ge.s32.totalorder %s24_s24, 18   ;;  %s2626_s19 = sld [smem:[#allocation10_spill]] }
 0x3f6   : > { %s2627_s20 = sld [smem:[#allocation6_spill]]  ;;  %s2631_s17 = smov %s2186_s18 }
 0x3f7   : > { %s2628_s21 = sld [smem:[#allocation7_spill]]  ;;  %23 = sbr.rel (!%p21_p0) target bundleno = 9 (0x9), region = 134 }
 0x3f8   : > { %s2629_s22 = sld [smem:[#allocation8_spill]] }
 0x3f9   : > { %s2630_s23 = sld [smem:[#allocation9_spill]] }
 0x3fa   : > { %s2632_s18 = smov %s2625_s1 }
 0x3fc   :  { %1843 = vsyncpa [#allocation3], 1 }
 0x3fd   :  { %1845 = vsyncpa [#allocation3 + $0x1], 1 }

</bundles_post_ra>
